<compile_context>
chip_gen: v7x
topology: tpu7x:2x2x1
jax: 0.10.0
libtpu: 0.0.40
codegen_flags: <defaults>
</compile_context>

<pallas_src>
import numpy as np
import jax
import jax.numpy as jnp
from jax import lax
from jax.experimental import pallas as pl
from jax.experimental.pallas import tpu as pltpu


def _round_up(x, m):
    return ((x + m - 1) // m) * m


def _hoe_kernel(plane_ref, wmat_ref, scal_ref, out_ref):
    # plane_ref: (2, TB, HW) -- [0] = channel-11 rows, [1] = channel-14 rows
    # wmat_ref:  (HW, 2)     -- col 0 = ones (spatial sum), col 1 = (w+1)/min(H,W)
    # scal_ref:  (TB, 4)     -- cols [y = pred14 - pred11, sin_gt, cos_gt, has]
    # out_ref:   (TB, 1)     -- per-sample masked loss term
    wmat = wmat_ref[...]

    # Spatial sum + column-weighted sum for both channels in two MXU dots.
    s11 = jnp.dot(plane_ref[0], wmat, preferred_element_type=jnp.float32)  # (TB, 2)
    s14 = jnp.dot(plane_ref[1], wmat, preferred_element_type=jnp.float32)  # (TB, 2)

    # W_value = weighted_sum / spatial_sum  (1/min(H,W) pre-folded into wmat).
    wv11 = s11[:, 1:2] / s11[:, 0:1]                                       # (TB, 1)
    wv14 = s14[:, 1:2] / s14[:, 0:1]                                       # (TB, 1)
    x = wv14 - wv11                                                        # (TB, 1)

    scal = scal_ref[...]                                                   # (TB, 4)
    y = scal[:, 0:1]
    sin_gt = scal[:, 1:2]
    cos_gt = scal[:, 2:3]
    has = scal[:, 3:4]

    # sin/cos of atan2(y, x) in closed form; atan2(0, 0) = 0 -> sin 0, cos 1.
    rsq = x * x + y * y
    safe = rsq > 0.0
    inv_r = jnp.where(safe, lax.rsqrt(jnp.where(safe, rsq, 1.0)), 0.0)
    sin_a = y * inv_r
    cos_a = jnp.where(safe, x * inv_r, 1.0)

    out_ref[...] = ((sin_a - sin_gt) ** 2 + (cos_a - cos_gt) ** 2) * has


def hoe_diff_loss(plane_output, depth_output, hoe_output_val, ind, has_hoe_label,
                  *, max_rows_per_step=256, vmem_budget_bytes=20 * 1024 * 1024):
    """JAX/Pallas equivalent of the PyTorch hoe_diff_loss.forward."""
    B, C, H, W = plane_output.shape
    HW = H * W
    f32 = jnp.float32

    # --- batch-tile size: fill MXU rows / amortize per-step overhead, bounded
    #     by the double-buffered plane tiles (2 bufs * 2 channels * TB * HW * 4B).
    max_tb = max(8, vmem_budget_bytes // (2 * 2 * HW * 4))
    tb = min(max_rows_per_step, max_tb, _round_up(B, 8))
    tb = max(8, (tb // 8) * 8)
    b_pad = _round_up(max(B, tb), tb)
    grid = (b_pad // tb,)

    # --- only channels 11 and 14 are consumed: two contiguous (B_pad, HW) row
    #     slabs, lane-dense last axis.  Pad extra rows with ones (finite ratio,
    #     masked out by has=0).
    ch11 = plane_output[:, 11].reshape(B, HW).astype(f32)
    ch14 = plane_output[:, 14].reshape(B, HW).astype(f32)
    plane2 = jnp.stack([ch11, ch14], axis=0)                               # (2, B, HW)
    if b_pad > B:
        plane2 = jnp.concatenate(
            [plane2, jnp.ones((2, b_pad - B, HW), f32)], axis=1)

    # --- depth gather hoisted out of the kernel: 2 scalars per sample.
    # depth_output is (B, 1, H, W); NHWC flatten == NCHW flatten for 1 channel,
    # reproducing _tranpose_and_gather_scalar's flat-index layout.
    depth_flat = depth_output.reshape(B, HW)
    ind2 = jnp.stack([ind[:, 11], ind[:, 14]], axis=1).astype(jnp.int32)   # (B, 2)
    pred = jnp.take_along_axis(depth_flat, ind2, axis=1).astype(f32)       # (B, 2)
    y = pred[:, 1] - pred[:, 0]                                            # pred14-pred11

    has = has_hoe_label.astype(f32)
    scal = jnp.stack([y,
                      jnp.sin(hoe_output_val).astype(f32),
                      jnp.cos(hoe_output_val).astype(f32),
                      has], axis=1)                                        # (B, 4)
    if b_pad > B:
        scal = jnp.concatenate([scal, jnp.zeros((b_pad - B, 4), f32)], axis=0)

    # --- reduction weights: col 0 -> plain spatial sum, col 1 -> column index
    #     weight (w+1) with 1/min(H,W) pre-folded in.
    col_w = (((jnp.arange(HW, dtype=jnp.int32) % W) + 1).astype(f32)
             / float(min(H, W)))
    wmat = jnp.stack([jnp.ones((HW,), f32), col_w], axis=1)                # (HW, 2)

    grid_spec = pltpu.PrefetchScalarGridSpec(
        num_scalar_prefetch=0,
        grid=grid,
        in_specs=[
            pl.BlockSpec((2, tb, HW), lambda i: (0, i, 0)),                # plane2
            pl.BlockSpec((HW, 2), lambda i: (0, 0)),                       # weights
            pl.BlockSpec((tb, 4), lambda i: (i, 0)),                       # per-sample scalars
        ],
        out_specs=pl.BlockSpec((tb, 1), lambda i: (i, 0)),
    )

    per_sample = pl.pallas_call(
        _hoe_kernel,
        out_shape=jax.ShapeDtypeStruct((b_pad, 1), f32),
        grid_spec=grid_spec,
        compiler_params=pltpu.CompilerParams(
            dimension_semantics=("parallel",),        # no carried accumulator
            vmem_limit_bytes=32 * 1024 * 1024,
        ),
    )(plane2, wmat, scal)

    # Final O(B) glue: sum of masked per-sample terms / (sum(has) + 1e-4).
    return per_sample.sum() / (has.sum() + 0.0001)


def _reference(plane, depth, hoe, ind, has):
    """Pure-JAX reference mirroring the PyTorch code."""
    B, C, H, W = plane.shape
    ps = plane.reshape(B, C, -1)
    ps = ps / ps.sum(2, keepdims=True)
    ps = ps.reshape(B, C, H, W)
    interg_h = ps.sum(2)
    wv = (interg_h * jnp.arange(1, W + 1, dtype=jnp.float32)).sum(2) / min(H, W)
    feat = jnp.transpose(depth, (0, 2, 3, 1)).reshape(B, -1)
    pred = jnp.take_along_axis(feat, ind, axis=1)
    hoe3d = jnp.arctan2(pred[:, 14] - pred[:, 11], wv[:, 14] - wv[:, 11])
    loss = (jnp.sin(hoe3d) - jnp.sin(hoe)) ** 2 + (jnp.cos(hoe3d) - jnp.cos(hoe)) ** 2
    loss = loss * has
    return loss.sum() / (has.sum() + 0.0001)


if __name__ == "__main__":
    key = jax.random.PRNGKey(0)
    k1, k2, k3, k4, k5 = jax.random.split(key, 5)

    B, C, H, W = 2, 17, 16, 16   # C must be >= 15 (joints 11 and 14 are indexed)
    N = 17                       # number of joints indexed by `ind`

    plane_output = jax.random.uniform(k1, (B, C, H, W), jnp.float32, 0.1, 1.0)
    depth_output = jax.random.normal(k2, (B, 1, H, W), jnp.float32)
    hoe_output_val = jax.random.uniform(k3, (B,), jnp.float32, -np.pi, np.pi)
    ind = jax.random.randint(k4, (B, N), 0, H * W, jnp.int32)
    has_hoe_label = (jax.random.uniform(k5, (B,)) > 0.2).astype(jnp.float32)

    loss = hoe_diff_loss(plane_output, depth_output, hoe_output_val, ind, has_hoe_label)
    loss = jax.block_until_ready(loss)

    ref = _reference(plane_output, depth_output, hoe_output_val, ind, has_hoe_label)
    assert np.allclose(np.asarray(loss), np.asarray(ref), atol=1e-5, rtol=1e-5), (loss, ref)

    print("KERNEL_OK")
</pallas_src>

<mosaic_0001>
module attributes {stable_mosaic.version = 11 : i64} {
  func.func @_hoe_kernel(%arg0: i32, %arg1: memref<2x8x256xf32, #tpu.memory_space<vmem>>, %arg2: memref<256x2xf32, #tpu.memory_space<vmem>>, %arg3: memref<8x4xf32, #tpu.memory_space<vmem>>, %arg4: memref<8x1xf32, #tpu.memory_space<vmem>>) attributes {dimension_semantics = [#tpu.dimension_semantics<parallel>], iteration_bounds = array<i64: 1>, scalar_prefetch = 0 : i64, scratch_operands = 0 : i64, tpu.core_type = #tpu.core_type<tc>, window_params = [{transform_indices = @transform_0, window_bounds = array<i64: 2, 8, 256>}, {pipeline_mode = #tpu.pipeline_mode<synchronous>, transform_indices = @transform_1, window_bounds = array<i64: 256, 2>}, {transform_indices = @transform_2, window_bounds = array<i64: 8, 4>}, {transform_indices = @transform_3, window_bounds = array<i64: 8, 1>}]} {
    %c0 = arith.constant 0 : index
    %c0_0 = arith.constant 0 : index
    %0 = vector.load %arg2[%c0, %c0_0] : memref<256x2xf32, #tpu.memory_space<vmem>>, vector<256x2xf32>
    %c0_1 = arith.constant 0 : index
    %c0_2 = arith.constant 0 : index
    %c0_3 = arith.constant 0 : index
    %1 = vector.load %arg1[%c0_1, %c0_2, %c0_3] : memref<2x8x256xf32, #tpu.memory_space<vmem>>, vector<1x8x256xf32>
    %2 = vector.shape_cast %1 : vector<1x8x256xf32> to vector<8x256xf32>
    %cst = arith.constant dense<0.000000e+00> : vector<8x2xf32>
    %3 = tpu.matmul %2, %0, %cst {dimension_numbers = #tpu.dot_dimension_numbers<[1], [0], [0], [1], [0, 0, 1, 1], [], []>} : vector<8x256xf32>, vector<256x2xf32>, vector<8x2xf32> -> vector<8x2xf32>
    %c1 = arith.constant 1 : index
    %c0_4 = arith.constant 0 : index
    %c0_5 = arith.constant 0 : index
    %4 = vector.load %arg1[%c1, %c0_4, %c0_5] : memref<2x8x256xf32, #tpu.memory_space<vmem>>, vector<1x8x256xf32>
    %5 = vector.shape_cast %4 : vector<1x8x256xf32> to vector<8x256xf32>
    %cst_6 = arith.constant dense<0.000000e+00> : vector<8x2xf32>
    %6 = tpu.matmul %5, %0, %cst_6 {dimension_numbers = #tpu.dot_dimension_numbers<[1], [0], [0], [1], [0, 0, 1, 1], [], []>} : vector<8x256xf32>, vector<256x2xf32>, vector<8x2xf32> -> vector<8x2xf32>
    %7 = vector.extract_strided_slice %3 {offsets = [0, 1], sizes = [8, 1], strides = [1, 1]} : vector<8x2xf32> to vector<8x1xf32>
    %8 = vector.extract_strided_slice %3 {offsets = [0, 0], sizes = [8, 1], strides = [1, 1]} : vector<8x2xf32> to vector<8x1xf32>
    %9 = arith.divf %7, %8 : vector<8x1xf32>
    %10 = vector.extract_strided_slice %6 {offsets = [0, 1], sizes = [8, 1], strides = [1, 1]} : vector<8x2xf32> to vector<8x1xf32>
    %11 = vector.extract_strided_slice %6 {offsets = [0, 0], sizes = [8, 1], strides = [1, 1]} : vector<8x2xf32> to vector<8x1xf32>
    %12 = arith.divf %10, %11 : vector<8x1xf32>
    %13 = arith.subf %12, %9 : vector<8x1xf32>
    %c0_7 = arith.constant 0 : index
    %c0_8 = arith.constant 0 : index
    %14 = vector.load %arg3[%c0_7, %c0_8] : memref<8x4xf32, #tpu.memory_space<vmem>>, vector<8x4xf32>
    %15 = vector.extract_strided_slice %14 {offsets = [0, 0], sizes = [8, 1], strides = [1, 1]} : vector<8x4xf32> to vector<8x1xf32>
    %16 = vector.extract_strided_slice %14 {offsets = [0, 1], sizes = [8, 1], strides = [1, 1]} : vector<8x4xf32> to vector<8x1xf32>
    %17 = vector.extract_strided_slice %14 {offsets = [0, 2], sizes = [8, 1], strides = [1, 1]} : vector<8x4xf32> to vector<8x1xf32>
    %18 = vector.extract_strided_slice %14 {offsets = [0, 3], sizes = [8, 1], strides = [1, 1]} : vector<8x4xf32> to vector<8x1xf32>
    %19 = arith.mulf %13, %13 : vector<8x1xf32>
    %20 = arith.mulf %15, %15 : vector<8x1xf32>
    %21 = arith.addf %19, %20 : vector<8x1xf32>
    %cst_9 = arith.constant 0.000000e+00 : f32
    %22 = vector.broadcast %cst_9 : f32 to vector<8x1xf32>
    %23 = arith.cmpf ogt, %21, %22 : vector<8x1xf32>
    %cst_10 = arith.constant 1.000000e+00 : f32
    %24 = vector.broadcast %cst_10 : f32 to vector<8x1xf32>
    %25 = arith.select %23, %21, %24 : vector<8x1xi1>, vector<8x1xf32>
    %26 = math.rsqrt %25 : vector<8x1xf32>
    %cst_11 = arith.constant 0.000000e+00 : f32
    %27 = vector.broadcast %cst_11 : f32 to vector<8x1xf32>
    %28 = arith.select %23, %26, %27 : vector<8x1xi1>, vector<8x1xf32>
    %29 = arith.mulf %15, %28 : vector<8x1xf32>
    %30 = arith.mulf %13, %28 : vector<8x1xf32>
    %cst_12 = arith.constant 1.000000e+00 : f32
    %31 = vector.broadcast %cst_12 : f32 to vector<8x1xf32>
    %32 = arith.select %23, %30, %31 : vector<8x1xi1>, vector<8x1xf32>
    %33 = arith.subf %29, %16 : vector<8x1xf32>
    %34 = arith.mulf %33, %33 : vector<8x1xf32>
    %35 = arith.subf %32, %17 : vector<8x1xf32>
    %36 = arith.mulf %35, %35 : vector<8x1xf32>
    %37 = arith.addf %34, %36 : vector<8x1xf32>
    %38 = arith.mulf %37, %18 : vector<8x1xf32>
    %c0_13 = arith.constant 0 : index
    %c0_14 = arith.constant 0 : index
    %39 = vector.load %arg4[%c0_13, %c0_14] : memref<8x1xf32, #tpu.memory_space<vmem>>, vector<8x1xf32>
    tpu.vector_store %arg4[%c0_13, %c0_14], %38 {strides = array<i32>} : memref<8x1xf32, #tpu.memory_space<vmem>>, vector<8x1xf32>,
    return
  }
  func.func @transform_0(%arg0: i32) -> (i32, i32, i32) {
    %c0_i32 = arith.constant 0 : i32
    %c0_i32_0 = arith.constant 0 : i32
    %c0_i32_1 = arith.constant 0 : i32
    return %c0_i32, %arg0, %c0_i32_0 : i32, i32, i32
  }
  func.func @transform_1(%arg0: i32) -> (i32, i32) {
    %c0_i32 = arith.constant 0 : i32
    %c0_i32_0 = arith.constant 0 : i32
    %c0_i32_1 = arith.constant 0 : i32
    return %c0_i32, %c0_i32_0 : i32, i32
  }
  func.func @transform_2(%arg0: i32) -> (i32, i32) {
    %c0_i32 = arith.constant 0 : i32
    %c0_i32_0 = arith.constant 0 : i32
    return %arg0, %c0_i32 : i32, i32
  }
  func.func @transform_3(%arg0: i32) -> (i32, i32) {
    %c0_i32 = arith.constant 0 : i32
    %c0_i32_0 = arith.constant 0 : i32
    return %arg0, %c0_i32 : i32, i32
  }
}

</mosaic_0001>

<bundles_post_ra>
// kernel: tpu_custom_call.1
= control target key start
LH: loop header
LB: loop body
LE: loop exit
PB: predicated region body
PF: predicated region fallthrough
CT: control target
= control target key end

     0   :  { %s392_s5 = smov 127   ;;  %vm240_vm1 = vcmask 7168   ;;  %s531_s1 = inlined_call_operand.vmem [shape: f32[256,2], index: 1, kind: input, shape index: {}]   ;;  %s532_s0 = inlined_call_operand.vmem [shape: f32[2,8,256], index: 0, kind: input, shape index: {}]   ;;  %s533_s2 = inlined_call_operand.vmem [shape: f32[8,4], index: 2, kind: input, shape index: {}]   ;;  %s534_s3 = inlined_call_operand.vmem [shape: f32[8,1], index: 3, kind: output, shape index: {}]  }
   0x1   :  { %v30_v0 = vld [vmem:[%s531_s1 + $0x80] sm:$0xff]  ;;  %v31_v1 = vld [vmem:[%s531_s1 + $0x88] sm:$0xff]  ;;  %v32_v5 = vld [vmem:[%s531_s1 + $0x90] sm:$0xff] }
   0x2   :  { %v14_v2 = vld [vmem:[%s531_s1] sm:$0xff]  ;;  %v318_v3 = vpack.c.bf16 %v31_v1, %v30_v0  ;;  %v15_v4 = vld [vmem:[%s531_s1 + $0x8] sm:$0xff]  ;;  %v33_v6 = vld [vmem:[%s531_s1 + $0x98] sm:$0xff] }
   0x3   :  { %v320_v7 = vpack.c.bf16 %v15_v4, %v14_v2  ;;  %v322_v8 = vpack.c.bf16 %v33_v6, %v32_v5  ;;  %v16_v9 = vld [vmem:[%s531_s1 + $0x10] sm:$0xff]  ;;  %v17_v10 = vld [vmem:[%s531_s1 + $0x18] sm:$0xff]  ;;  %v34_v11 = vld [vmem:[%s531_s1 + $0xa0] sm:$0xff] }
   0x4   :  { %319 = vmatprep.subr.bf16.mxu0 %v318_v3  ;;  %351 = vmatprep.subr.bf16.mxu1 %v318_v3  ;;  %v35_v12 = vld [vmem:[%s531_s1 + $0xa8] sm:$0xff]  ;;  %v324_v13 = vpack.c.bf16 %v17_v10, %v16_v9  ;;  %v18_v15 = vld [vmem:[%s531_s1 + $0x20] sm:$0xff]  ;;  %v36_v17 = vld [vmem:[%s531_s1 + $0xb0] sm:$0xff] }
   0x5   :  { %321 = vmatpush3.bf16.msra.mxu0 %v320_v7  ;;  %353 = vmatpush3.bf16.msra.mxu1 %v320_v7  ;;  %v326_v14 = vpack.c.bf16 %v35_v12, %v34_v11  ;;  %v19_v16 = vld [vmem:[%s531_s1 + $0x28] sm:$0xff]  ;;  %v37_v18 = vld [vmem:[%s531_s1 + $0xb8] sm:$0xff]  ;;  %v20_v21 = vld [vmem:[%s531_s1 + $0x30] sm:$0xff] }
   0x6   :  { %323 = vmatprep.subr.bf16.mxu0 %v322_v8  ;;  %355 = vmatprep.subr.bf16.mxu1 %v322_v8  ;;  %v328_v19 = vpack.c.bf16 %v19_v16, %v18_v15  ;;  %v330_v20 = vpack.c.bf16 %v37_v18, %v36_v17  ;;  %v21_v22 = vld [vmem:[%s531_s1 + $0x38] sm:$0xff]  ;;  %v38_v23 = vld [vmem:[%s531_s1 + $0xc0] sm:$0xff]  ;;  %v39_v24 = vld [vmem:[%s531_s1 + $0xc8] sm:$0xff] }
   0x7   :  { %v47_v25 = vld [vmem:[%s532_s0 + $0x8] sm:$0xff]  ;;  %v247_v26 = vld [vmem:[%s532_s0 + $0x18] sm:$0xff]  ;;  %v332_v27 = vpack.c.bf16 %v21_v22, %v20_v21  ;;  %v334_v28 = vpack.c.bf16 %v39_v24, %v38_v23  ;;  %v22_v29 = vld [vmem:[%s531_s1 + $0x40] sm:$0xff] }
   0x8   :  { %112 = vmatprep.mubr.f32.mxu0 %v47_v25  ;;  %v23_v30 = vld [vmem:[%s531_s1 + $0x48] sm:$0xff]  ;;  %v40_v31 = vld [vmem:[%s531_s1 + $0xd0] sm:$0xff]  ;;  %v41_v32 = vld [vmem:[%s531_s1 + $0xd8] sm:$0xff]  ;;  %185 = vmatprep.mubr.f32.mxu1 %v247_v26 }
   0x9   :  { %325 = vmatpush3.bf16.msra.mxu0 %v324_v13  ;;  %357 = vmatpush3.bf16.msra.mxu1 %v324_v13  ;;  %v336_v33 = vpack.c.bf16 %v23_v30, %v22_v29  ;;  %v338_v34 = vpack.c.bf16 %v41_v32, %v40_v31  ;;  %v24_v35 = vld [vmem:[%s531_s1 + $0x50] sm:$0xff]  ;;  %v25_v36 = vld [vmem:[%s531_s1 + $0x58] sm:$0xff]  ;;  %v42_v37 = vld [vmem:[%s531_s1 + $0xe0] sm:$0xff] }
   0xa   :  { %327 = vmatprep.subr.bf16.mxu0 %v326_v14  ;;  %359 = vmatprep.subr.bf16.mxu1 %v326_v14  ;;  %v43_v38 = vld [vmem:[%s531_s1 + $0xe8] sm:$0xff]  ;;  %v340_v39 = vpack.c.bf16 %v25_v36, %v24_v35  ;;  %v26_v41 = vld [vmem:[%s531_s1 + $0x60] sm:$0xff]  ;;  %v44_v43 = vld [vmem:[%s531_s1 + $0xf0] sm:$0xff] }
   0xb   :  { %v342_v40 = vpack.c.bf16 %v43_v38, %v42_v37  ;;  %v27_v42 = vld [vmem:[%s531_s1 + $0x68] sm:$0xff]  ;;  %v45_v44 = vld [vmem:[%s531_s1 + $0xf8] sm:$0xff]  ;;  %v28_v47 = vld [vmem:[%s531_s1 + $0x70] sm:$0xff] }
   0xc   :  { %v344_v45 = vpack.c.bf16 %v27_v42, %v26_v41  ;;  %v346_v46 = vpack.c.bf16 %v45_v44, %v44_v43  ;;  %v29_v48 = vld [vmem:[%s531_s1 + $0x78] sm:$0xff]  ;;  %v46_v50 = vld [vmem:[%s532_s0] sm:$0xff]  ;;  %v246_v51 = vld [vmem:[%s532_s0 + $0x10] sm:$0xff]  ;;  %s391_s1 = smov 1   ;;  %s393_s0 = smov 125  }
   0xd   :  { %329 = vmatpush3.bf16.msra.mxu0 %v328_v19  ;;  %361 = vmatpush3.bf16.msra.mxu1 %v328_v19  ;;  %v348_v49 = vpack.c.bf16 %v29_v48, %v28_v47  ;;  %v204_v52 = vld [vmem:[%s533_s2] sm:$0xff] }
   0xe   :  { %331 = vmatprep.subr.bf16.mxu0 %v330_v20  ;;  %363 = vmatprep.subr.bf16.mxu1 %v330_v20  ;;  %v206_v53 = vmul.f32 %v204_v52, %v204_v52 }
  0x10   :  { %208 = vrot.lane.b32.xlu1 %v206_v53, %s391_s1 }
  0x11   :  { %333 = vmatpush3.bf16.msra.mxu0 %v332_v27  ;;  %365 = vmatpush3.bf16.msra.mxu1 %v332_v27 }
  0x12   :  { %335 = vmatprep.subr.bf16.mxu0 %v334_v28  ;;  %367 = vmatprep.subr.bf16.mxu1 %v334_v28 }
  0x14   :  { %224 = vrot.lane.b32.xlu1 %v204_v52, %s392_s5 }
  0x15   :  { %337 = vmatpush3.bf16.msra.mxu0 %v336_v33  ;;  %369 = vmatpush3.bf16.msra.mxu1 %v336_v33 }
  0x16   :  { %339 = vmatprep.subr.bf16.mxu0 %v338_v34  ;;  %371 = vmatprep.subr.bf16.mxu1 %v338_v34 }
  0x19   :  { %341 = vmatpush3.bf16.msra.mxu0 %v340_v39  ;;  %373 = vmatpush3.bf16.msra.mxu1 %v340_v39 }
  0x1a   :  { %343 = vmatprep.subr.bf16.mxu0 %v342_v40  ;;  %375 = vmatprep.subr.bf16.mxu1 %v342_v40 }
  0x1d   :  { %345 = vmatpush3.bf16.msra.mxu0 %v344_v45  ;;  %377 = vmatpush3.bf16.msra.mxu1 %v344_v45 }
  0x1e   :  { %347 = vmatprep.subr.bf16.mxu0 %v346_v46  ;;  %379 = vmatprep.subr.bf16.mxu1 %v346_v46 }
  0x21   :  { %349 = vmatpush3.bf16.msra.mxu0 %v348_v49  ;;  %381 = vmatpush3.bf16.msra.mxu1 %v348_v49 }
  0x24   :  { %113 = vmatmul.mubr.f32.vlgmr.msra.gmra.mrb[0].mxu0 %v46_v50  ;;  %186 = vmatmul.mubr.f32.vlgmr.msra.gmra.mrb[0].mxu1 %v246_v51 }
  0x82   :  { %v209_v3 = vpop.permute.xlu1 %208 }
  0x86   :  { %v225_v10 = vpop.permute.xlu1 %224 }
  0xf7   :  { %v280_v54 = vpop.f32.mrb[0].mxu0  ;;  %v315_v55 = vpop.f32.mrb[0].mxu1 }
  0xf8   :  { %v281_v56 = vpop.f32.mrb[1].mxu0  ;;  %v316_v57 = vpop.f32.mrb[1].mxu1 }
  0xf9   :  { %v282_v58 = vadd.f32 %v281_v56, %v280_v54  ;;  %v317_v59 = vadd.f32 %v316_v57, %v315_v55 }
  0xfb   :  { %192 = vrot.lane.b32.xlu0 %v282_v58, %s391_s1 }
  0xff   :  { %198 = vrot.lane.b32.xlu0 %v317_v59, %s391_s1 }
 0x16d   :  { %v193_v60 = vpop.permute.xlu0 %192 }
 0x16e   :  { %385 = vrcp.f32 %v193_v60 }
 0x171   :  { %v199_v61 = vpop.permute.xlu0 %198 }
 0x172   :  { %387 = vrcp.f32 %v199_v61 }
 0x178   :  { %v386_v62 = vpop.eup %385 }
 0x179   :  { %v196_v0 = vmul.f32 %v386_v62, %v282_v58 }
 0x17c   :  { %v388_v63 = vpop.eup %387 }
 0x17d   :  { %v202_v1 = vmul.f32 %v388_v63, %v317_v59 }
 0x17f   :  { %v203_v2 = vsub.f32 %v202_v1, %v196_v0 }
 0x181   :  { %v205_v4 = vmul.f32 %v203_v2, %v203_v2 }
 0x183   :  { %v211_v5 = vadd.f32 %v209_v3, %v205_v4 }
 0x185   :  { %vm212_vm0 = vcmp.gt.f32.partialorder %v211_v5, 0.0 }
 0x186   :  { %v213_v6 = vsel %vm212_vm0, %v211_v5, 1.0 }
 0x187   :  { %389 = vrsqrt.f32 %v213_v6 }
 0x191   :  { %v390_v7 = vpop.eup %389 }
 0x192   :  { %v215_v8 = vsel %vm212_vm0, %v390_v7, 0.0 }
 0x193   :  { %217 = vrot.lane.b32.xlu0 %v215_v8, %s392_s5  ;;  %v221_v9 = vmul.f32 %v215_v8, %v203_v2 }
 0x195   :  { %v222_v11 = vsel %vm212_vm0, %v221_v9, 1.0 }
 0x196   :  { %v229_v12 = vsub.f32 %v222_v11, %v225_v10 }
 0x197   :  { %236 = vrot.lane.b32.xlu0 %v204_v52, %s393_s0 }
 0x198   :  { %v230_v13 = vmul.f32 %v229_v12, %v229_v12 }
 0x19a   :  { %232 = vrot.lane.b32.xlu1 %v230_v13, %s392_s5 }
 0x205   :  { %v218_v14 = vpop.permute.xlu0 %217 }
 0x206   :  { %v220_v15 = vmul.f32 %v218_v14, %v204_v52 }
 0x208   :  { %v227_v16 = vsub.f32 %v220_v15, %v225_v10 }
 0x209   :  { %v237_v19 = vpop.permute.xlu0 %236 }
 0x20a   :  { %v228_v17 = vmul.f32 %v227_v16, %v227_v16 }
 0x20c   :  { %v233_v18 = vpop.permute.xlu1 %232 }
 0x20d   :  { %v235_v20 = vadd.f32 %v233_v18, %v228_v17 }
 0x20f   :  { %v239_v21 = vmul.f32 %v237_v19, %v235_v20 }
 0x211   :  { %241 = vst.msk [vmem:[%s534_s3] sm:$0xff] %vm240_vm1, %v239_v21 }

</bundles_post_ra>
